<compile_context>
chip_gen: v7x
topology: tpu7x:2x2x1
jax: 0.10.0
libtpu: 0.0.40
codegen_flags: <defaults>
</compile_context>

<pallas_src>
import math
from functools import partial

import jax
import jax.numpy as jnp
from jax.experimental import pallas as pl
from jax.experimental.pallas import tpu as pltpu


def _round_up(x, m):
    return ((x + m - 1) // m) * m


def _fpe_fhrr_kernel(x_ref, w_ref, cos_ref, sin_ref):
    # x_ref: (tB, F)   w_ref: (F, tD)   cos_ref/sin_ref: (tB, tD), all f32.
    x = x_ref[...]
    w = w_ref[...]
    f_in = x.shape[-1]                    # static (block shape)

    if f_in <= 8:
        # Exact-f32 unrolled outer-product accumulation on the VPU.  At K=4
        # the MXU would be >97% idle while still paying full vmatmul + result
        # drain latency per tile, and an f32 MXU dot risks a multi-pass /
        # bf16-demoted lowering that perturbs the phases feeding cos/sin.
        phases = x[:, 0:1] * w[0:1, :]
        for k in range(1, f_in):
            phases = phases + x[:, k:k + 1] * w[k:k + 1, :]
    else:
        # Larger contractions: let the MXU do it, but exactly.
        phases = jnp.dot(x, w, preferred_element_type=jnp.float32,
                         precision=jax.lax.Precision.HIGHEST)

    cos_ref[...] = jnp.cos(phases)        # EUP
    sin_ref[...] = jnp.sin(phases)        # EUP


def prepare_fpe_weight(weight, bandwidth=1.0):
    """One-time prep (off the hot path): torch-layout (D, F) weight ->
    bandwidth-folded, transposed (F, D) so out_features sits on the lane axis."""
    return (jnp.float32(bandwidth) * jnp.asarray(weight, jnp.float32)).T


@partial(jax.jit,
         static_argnames=("block_b", "block_d", "to_complex", "out_buffers"))
def fpe_fhrr_encode(x, weight_t, *, block_b=512, block_d=2048,
                    to_complex=False, out_buffers=None):
    """FPE forward (FHRR).

    Args:
      x:          (*, F) float input values (any leading batch dims).
      weight_t:   (F, D) float32 bandwidth-folded phase matrix from
                  prepare_fpe_weight.
      block_b:    max batch tile (multiple of 8).
      block_d:    max hypervector tile (multiple of 128).
      to_complex: if True return complex64 hypervectors (torch parity, adds an
                  XLA epilogue that triples HBM traffic); default False returns
                  the (cos, sin) f32 pair with no extra HBM pass.
      out_buffers: optional output pipeline depth (v5e store-bound tuning knob);
                  None keeps default double buffering.
    """
    assert block_b % 8 == 0, "block_b must be a multiple of 8"
    assert block_d % 128 == 0, "block_d must be a multiple of 128"

    x = jnp.asarray(x, jnp.float32)
    F_in, D = weight_t.shape
    batch_shape = x.shape[:-1]
    assert x.shape[-1] == F_in, "in_features mismatch"

    x2 = x.reshape(-1, F_in)
    B = x2.shape[0]

    # --- tile selection -----------------------------------------------------
    # Full extent for small dims (always legal); otherwise the aligned block
    # size.  The cdiv grid + BlockSpec tiling handles ragged edges.
    tB = B if B <= block_b else block_b
    tD = D if D <= block_d else block_d

    # Keep >= 2 grid points so v7x's two TensorCores both get work
    # (a (1, 1) grid silently halves v7x throughput).  Prefer splitting D
    # (lane axis, stays 128-aligned) and put it on the outer grid axis.
    if pl.cdiv(B, tB) * pl.cdiv(D, tD) < 2:
        if D > 128:
            tD = min(tD, _round_up(pl.cdiv(D, 2), 128))
        elif B > 8:
            tB = min(tB, _round_up(pl.cdiv(B, 2), 8))

    # Chip-aware VMEM budget: leave headroom for compiler-internal scratch so
    # we never request all of v7x's 64 MiB.
    try:
        vmem_cap = int(pltpu.get_tpu_info().vmem_capacity_bytes)
    except Exception:
        vmem_cap = 64 * 1024 * 1024            # v7x worst case
    budget = vmem_cap - 16 * 1024 * 1024

    n_out_buf = 2 if out_buffers is None else max(2, int(out_buffers))

    def _footprint(tb, td):
        ins = 2 * (tb * F_in + F_in * td)       # double-buffered x + weight
        outs = n_out_buf * 2 * tb * td          # cos + sin tiles, n-buffered
        return 4 * (ins + outs)                 # f32 bytes

    # Shrink tiles until the pipelined footprint fits the per-chip budget.
    while _footprint(tB, tD) > budget and tD > 128:
        tD = max(128, _round_up(tD // 2, 128))
    while _footprint(tB, tD) > budget and tB > 8:
        tB = max(8, _round_up(tB // 2, 8))

    # Grid: D-tiles OUTER, B-tiles inner -> the weight tile index (0, j) is
    # constant across the inner loop, so it is DMA'd once per D-tile (one full
    # weight sweep total) instead of once per grid step.
    grid = (pl.cdiv(D, tD), pl.cdiv(B, tB))

    vmem_limit = int(min(budget,
                         max(32 * 1024 * 1024, _footprint(tB, tD) + (2 << 20))))

    out_spec_kwargs = {}
    if out_buffers is not None:
        out_spec_kwargs["pipeline_mode"] = pl.Buffered(out_buffers)

    cos_out, sin_out = pl.pallas_call(
        _fpe_fhrr_kernel,
        out_shape=(
            jax.ShapeDtypeStruct((B, D), jnp.float32),
            jax.ShapeDtypeStruct((B, D), jnp.float32),
        ),
        grid_spec=pltpu.PrefetchScalarGridSpec(
            num_scalar_prefetch=0,
            grid=grid,
            in_specs=[
                pl.BlockSpec((tB, F_in), lambda j, i: (i, 0)),   # x tile
                pl.BlockSpec((F_in, tD), lambda j, i: (0, j)),   # weight tile
            ],
            out_specs=[
                pl.BlockSpec((tB, tD), lambda j, i: (i, j), **out_spec_kwargs),
                pl.BlockSpec((tB, tD), lambda j, i: (i, j), **out_spec_kwargs),
            ],
        ),
        compiler_params=pltpu.CompilerParams(
            dimension_semantics=("parallel", "parallel"),
            vmem_limit_bytes=vmem_limit,
        ),
    )(x2, weight_t)

    cos_out = cos_out.reshape(*batch_shape, D)
    sin_out = sin_out.reshape(*batch_shape, D)

    if to_complex:
        # No complex dtype on the TPU vector units and XLA cannot bitcast
        # f32 -> complex64; this epilogue re-reads/re-writes 16 B/elem, so it
        # is opt-in (torch parity) rather than the hot-path default.
        return jax.lax.complex(cos_out, sin_out)
    return cos_out, sin_out


def fractional_power_fhrr(x, weight, bandwidth=1.0, **kwargs):
    """Torch-parity convenience wrapper: weight in torch layout (D, F).
    Prefer prepare_fpe_weight(...) once + fpe_fhrr_encode(...) on the hot path."""
    return fpe_fhrr_encode(x, prepare_fpe_weight(weight, bandwidth), **kwargs)


def init_fractional_power_weight(key, in_features, out_features,
                                 distribution="sinc"):
    """Deterministic equivalent of FractionalPower.reset_parameters (FHRR)."""
    if distribution == "sinc":
        return jax.random.uniform(
            key, (out_features, in_features),
            minval=-math.pi, maxval=math.pi, dtype=jnp.float32)
    elif distribution == "gaussian":
        return jax.random.normal(
            key, (out_features, in_features), dtype=jnp.float32)
    else:
        raise ValueError(f"unsupported distribution: {distribution}")


if __name__ == "__main__":
    key = jax.random.PRNGKey(0)
    k_w, k_x = jax.random.split(key)

    # Small shapes consistent with the module: batch=16, in_features=4,
    # out_features=256 (hypervector dimensionality, lane-dense last dim).
    in_features = 4
    out_features = 256
    batch = 16
    bandwidth = 0.5

    weight = init_fractional_power_weight(k_w, in_features, out_features, "sinc")
    x = jax.random.normal(k_x, (batch, in_features), dtype=jnp.float32)

    # One-time weight prep (transpose + bandwidth fold) off the hot path.
    weight_t = prepare_fpe_weight(weight, bandwidth)

    # Hot path: split (cos, sin) f32 slabs; small blocks force a real (2, 2)
    # grid on this tiny example.
    cos_hv, sin_hv = jax.block_until_ready(
        fpe_fhrr_encode(x, weight_t, block_b=8, block_d=128))

    # Torch-parity path: complex64 output, default (auto-clamped) tile config.
    hv = jax.block_until_ready(
        fractional_power_fhrr(x, weight, bandwidth, to_complex=True))

    # Reference check against plain JAX (same math as the torch forward).
    phases_ref = (bandwidth * x) @ weight.T
    hv_ref = jax.lax.complex(jnp.cos(phases_ref), jnp.sin(phases_ref))

    assert cos_hv.shape == (batch, out_features)
    assert sin_hv.shape == (batch, out_features)
    assert jnp.allclose(cos_hv, jnp.cos(phases_ref), atol=2e-5, rtol=2e-5)
    assert jnp.allclose(sin_hv, jnp.sin(phases_ref), atol=2e-5, rtol=2e-5)
    assert hv.shape == (batch, out_features)
    assert hv.dtype == jnp.complex64
    assert jnp.allclose(hv, hv_ref, atol=2e-5, rtol=2e-5)

    print("KERNEL_OK")
</pallas_src>

<mosaic_0001>
module attributes {stable_mosaic.version = 11 : i64} {
  func.func @_fpe_fhrr_kernel(%arg0: i32, %arg1: i32, %arg2: memref<8x4xf32, #tpu.memory_space<vmem>>, %arg3: memref<4x128xf32, #tpu.memory_space<vmem>>, %arg4: memref<8x128xf32, #tpu.memory_space<vmem>>, %arg5: memref<8x128xf32, #tpu.memory_space<vmem>>) attributes {dimension_semantics = [#tpu.dimension_semantics<parallel>, #tpu.dimension_semantics<parallel>], iteration_bounds = array<i64: 2, 2>, scalar_prefetch = 0 : i64, scratch_operands = 0 : i64, tpu.core_type = #tpu.core_type<tc>, window_params = [{transform_indices = @transform_0, window_bounds = array<i64: 8, 4>}, {transform_indices = @transform_1, window_bounds = array<i64: 4, 128>}, {transform_indices = @transform_2, window_bounds = array<i64: 8, 128>}, {transform_indices = @transform_3, window_bounds = array<i64: 8, 128>}]} {
    %c0 = arith.constant 0 : index
    %c0_0 = arith.constant 0 : index
    %0 = vector.load %arg2[%c0, %c0_0] : memref<8x4xf32, #tpu.memory_space<vmem>>, vector<8x4xf32>
    %c0_1 = arith.constant 0 : index
    %c0_2 = arith.constant 0 : index
    %1 = vector.load %arg3[%c0_1, %c0_2] : memref<4x128xf32, #tpu.memory_space<vmem>>, vector<4x128xf32>
    %2 = vector.extract_strided_slice %0 {offsets = [0, 0], sizes = [8, 1], strides = [1, 1]} : vector<8x4xf32> to vector<8x1xf32>
    %3 = vector.extract_strided_slice %1 {offsets = [0, 0], sizes = [1, 128], strides = [1, 1]} : vector<4x128xf32> to vector<1x128xf32>
    %4 = vector.broadcast %2 : vector<8x1xf32> to vector<8x128xf32>
    %5 = vector.broadcast %3 : vector<1x128xf32> to vector<8x128xf32>
    %6 = arith.mulf %4, %5 : vector<8x128xf32>
    %7 = vector.extract_strided_slice %0 {offsets = [0, 1], sizes = [8, 1], strides = [1, 1]} : vector<8x4xf32> to vector<8x1xf32>
    %8 = vector.extract_strided_slice %1 {offsets = [1, 0], sizes = [1, 128], strides = [1, 1]} : vector<4x128xf32> to vector<1x128xf32>
    %9 = vector.broadcast %7 : vector<8x1xf32> to vector<8x128xf32>
    %10 = vector.broadcast %8 : vector<1x128xf32> to vector<8x128xf32>
    %11 = arith.mulf %9, %10 : vector<8x128xf32>
    %12 = arith.addf %6, %11 : vector<8x128xf32>
    %13 = vector.extract_strided_slice %0 {offsets = [0, 2], sizes = [8, 1], strides = [1, 1]} : vector<8x4xf32> to vector<8x1xf32>
    %14 = vector.extract_strided_slice %1 {offsets = [2, 0], sizes = [1, 128], strides = [1, 1]} : vector<4x128xf32> to vector<1x128xf32>
    %15 = vector.broadcast %13 : vector<8x1xf32> to vector<8x128xf32>
    %16 = vector.broadcast %14 : vector<1x128xf32> to vector<8x128xf32>
    %17 = arith.mulf %15, %16 : vector<8x128xf32>
    %18 = arith.addf %12, %17 : vector<8x128xf32>
    %19 = vector.extract_strided_slice %0 {offsets = [0, 3], sizes = [8, 1], strides = [1, 1]} : vector<8x4xf32> to vector<8x1xf32>
    %20 = vector.extract_strided_slice %1 {offsets = [3, 0], sizes = [1, 128], strides = [1, 1]} : vector<4x128xf32> to vector<1x128xf32>
    %21 = vector.broadcast %19 : vector<8x1xf32> to vector<8x128xf32>
    %22 = vector.broadcast %20 : vector<1x128xf32> to vector<8x128xf32>
    %23 = arith.mulf %21, %22 : vector<8x128xf32>
    %24 = arith.addf %18, %23 : vector<8x128xf32>
    %25 = math.cos %24 : vector<8x128xf32>
    %c0_3 = arith.constant 0 : index
    %c0_4 = arith.constant 0 : index
    %26 = vector.load %arg4[%c0_3, %c0_4] : memref<8x128xf32, #tpu.memory_space<vmem>>, vector<8x128xf32>
    tpu.vector_store %arg4[%c0_3, %c0_4], %25 {strides = array<i32>} : memref<8x128xf32, #tpu.memory_space<vmem>>, vector<8x128xf32>,
    %27 = math.sin %24 : vector<8x128xf32>
    %c0_5 = arith.constant 0 : index
    %c0_6 = arith.constant 0 : index
    %28 = vector.load %arg5[%c0_5, %c0_6] : memref<8x128xf32, #tpu.memory_space<vmem>>, vector<8x128xf32>
    tpu.vector_store %arg5[%c0_5, %c0_6], %27 {strides = array<i32>} : memref<8x128xf32, #tpu.memory_space<vmem>>, vector<8x128xf32>,
    return
  }
  func.func @transform_0(%arg0: i32, %arg1: i32) -> (i32, i32) {
    %c0_i32 = arith.constant 0 : i32
    %c0_i32_0 = arith.constant 0 : i32
    return %arg1, %c0_i32 : i32, i32
  }
  func.func @transform_1(%arg0: i32, %arg1: i32) -> (i32, i32) {
    %c0_i32 = arith.constant 0 : i32
    %c0_i32_0 = arith.constant 0 : i32
    return %c0_i32, %arg0 : i32, i32
  }
  func.func @transform_2(%arg0: i32, %arg1: i32) -> (i32, i32) {
    %c0_i32 = arith.constant 0 : i32
    return %arg1, %arg0 : i32, i32
  }
  func.func @transform_3(%arg0: i32, %arg1: i32) -> (i32, i32) {
    %c0_i32 = arith.constant 0 : i32
    return %arg1, %arg0 : i32, i32
  }
}

</mosaic_0001>

<bundles_post_ra>
// kernel: fpe_fhrr_encode.1
= control target key start
LH: loop header
LB: loop body
LE: loop exit
PB: predicated region body
PF: predicated region fallthrough
CT: control target
= control target key end

     0   :  { %9 = vsyncpa [#allocation3], 0  ;;  %s1096_s0 = inlined_call_operand.vmem [shape: f32[16,4], index: 0, kind: input, shape index: {}]   ;;  %s1097_s1 = inlined_call_operand.vmem [shape: f32[4,256], index: 1, kind: input, shape index: {}]   ;;  %s1098_s2 = inlined_call_operand.hbm [shape: f32[16,256], index: 2, kind: output, shape index: {0}]   ;;  %s1099_s3 = inlined_call_operand.hbm [shape: f32[16,256], index: 3, kind: output, shape index: {1}]  }
   0x1   :  { %11 = vsyncpa [#allocation3 + $0x1], 0 }
   0x2   :  { %12 = vsyncpa [#allocation5], 0 }
   0x3   :  { %14 = vsyncpa [#allocation5 + $0x1], 0  ;;  %s899_s12 = smov 0   ;;  %s901_s13 = smov 0  }
   0x4   :  { %s903_s14 = smov 0   ;;  %s905_s15 = smov 0  }
   0x5   :  { %s907_s16 = smov 0   ;;  %s909_s17 = smov 0  }
   0x6   :  { %s911_s18 = smov 0   ;;  %s913_s19 = smov 0  }
   0x7 LB: > { %s615_s20 = sadd.s32 4294967295, %s865_s19   ;;  %s616_s21 = sadd.s32 4294967294, %s865_s19   ;;  %s865_s19 = sphi %s913_s19, %s20_s19   ;;  %s861_s18 = sphi %s911_s18, %s1108_s18   ;;  %s857_s17 = sphi %s909_s17, %s1107_s17   ;;  %s853_s16 = sphi %s907_s16, %s1106_s16   ;;  %s849_s15 = sphi %s905_s15, %s1105_s15   ;;  %s845_s14 = sphi %s903_s14, %s1104_s14   ;;  %s841_s13 = sphi %s901_s13, %s1103_s13   ;;  %s837_s12 = sphi %s899_s12, %s1102_s12  }
   0x8   : > { %s29_s22 = sadd.s32 1, %s857_s17  ;;  %s32_s23 = sadd.s32 1, %s861_s18 }
   0x9   : > { %p30_p0 = scmp.ge.s32.totalorder %s29_s22, 2  ;;  %p103_p1 = scmp.ne.s32.totalorder %s845_s14, %s841_s13 }
   0xa   : > { %p104_p2 = scmp.eq.s32.totalorder %s615_s20, 3  ;;  %p109_p5 = scmp.ne.s32.totalorder %s841_s13, %s837_s12 }
   0xb   : > { %s1110_s22 = smov (%p30_p0, %s29_s22), 0  ;;  %s1112_s23 = smov (!%p30_p0, %s32_s23), %s861_s18 }
   0xc   : > { %s88_s24 = ssub.s32 %s857_s17, %s1110_s22  ;;  %p950_p3 = por %p104_p2, %p103_p1 }
   0xd   : > { %p34_p4 = scmp.ge.s32.totalorder %s1112_s23, 2  ;;  %p110_p6 = scmp.eq.s32.totalorder %s616_s21, 3 }
   0xe   : > { %p619_p7 = scmp.ge.s32.totalorder %s865_s19, 1  ;;  %p170_p9 = scmp.lt.s32.totalorder %s865_s19, 5 }
   0xf   : > { %s1114_s23 = smov (%p34_p4, %s1112_s23), 0  ;;  %p959_p8 = por %p110_p6, %p109_p5 }
  0x10   : > { %s89_s27 = ssub.s32 %s861_s18, %s1114_s23  ;;  %s93_s28 = sadd.s32 1, %s845_s14 }
  0x11   : > { %s90_s29 = sor.u32 %s89_s27, %s88_s24  ;;  %p171_p10 = pnand %p619_p7, %p170_p9 }
  0x12   : > { %p91_p11 = scmp.eq.s32.totalorder %s90_s29, 0  ;;  %p202_p12 = scmp.lt.s32.totalorder (!%p171_p10), %s849_s15, 1  ;;  %v867_v0 = vmov (!%p171_p10), 0   ;;  %v868_v1 = vmov (!%p171_p10), 2   ;;  %v869_v3 = vmov (!%p171_p10), 1   ;;  %v870_v4 = vmov (!%p171_p10), 3  }
  0x13   : > { %174 = sbr.rel (%p171_p10) target bundleno = 288 (0x120), region = 28  ;;  %730 = vset.pattern.permute.xlu0 (!%p171_p10), %v867_v0  ;;  %732 = vset.pattern.permute.xlu1 (!%p171_p10), %v868_v1  ;;  %p206_p13 = scmp.lt.s32.totalorder (!%p171_p10), %s853_s16, 1  ;;  %v217_v5 = vlaneseq (!%p171_p10)  ;;  %v871_v37 = vmov (!%p171_p10), 683565275   ;;  %v872_v39 = vmov (!%p171_p10), 2475754826  }
  0x14   : > { %s968_s30 = scalar_select %p91_p11, %s845_s14, %s93_s28  }
  0x15   : > { %v218_v6 = vshrl.u32 (!%p171_p10), %v217_v5, 7  ;;  %v873_v42 = vmov (!%p171_p10), 2131351028   ;;  %v874_v45 = vmov (!%p171_p10), 2102212464   ;;  %s1001_s24 = sand.u32 (!%p171_p10), 1, %s841_s13  }
  0x16   : > { %v875_v48 = vmov (!%p171_p10), 920167782   ;;  %v876_v51 = vmov (!%p171_p10), 1326507024   ;;  %s634_s27 = sshll.u32 (!%p171_p10), %s849_s15, 1  ;;  %s620_s28 = sshll.u32 (!%p171_p10), %s1001_s24, 3 }
  0x17   : > { %v219_v7 = vsub.s32 (!%p171_p10), 0, %v218_v6  ;;  %v228_v8 = vsub.s32 (!%p171_p10), 1, %v218_v6  ;;  %v238_v11 = vsub.s32 (!%p171_p10), 2, %v218_v6  ;;  %v248_v13 = vsub.s32 (!%p171_p10), 3, %v218_v6  ;;  %s1006_s29 = sadd.s32 (!%p171_p10), %s853_s16, %s634_s27 }
  0x1a   : > { %s203_s4 = scalar_select %p202_p12, %s849_s15, 1 }
  0x1b   : > { %s207_s9 = scalar_select %p206_p13, %s853_s16, 1 }
  0x1c   : > { %s622_s5 = sshll.u32 %s203_s4, 3  ;;  %s635_s4 = sshll.u32 %s1006_s29, 7 }
  0x1d   : > { %s205_s8 = scalar_lea.vmem %s1096_s0, %s622_s5  ;;  %s623_s10 = sshll.u32 %s207_s9, 2 }
  0x1e   : > { %v210_v2 = vld [vmem:[%s205_s8] sm:$0xff]  ;;  %s209_s21 = scalar_lea.vmem %s1097_s1, %s623_s10  ;;  %s194_s5 = scalar_lea.vmem [#allocation2], %s620_s28 }
  0x1f   : > { %214 = vperm.xlu0 %730, %v210_v2   ;;  %233 = vperm.xlu1 %732, %v210_v2   ;;  %v211_v9 = vld [vmem:[%s209_s21] sm:$0xf]  ;;  %s482_s6 = sshll.u32 %s194_s5, 4  ;;  %s201_s15 = scalar_lea.vmem [#allocation4], %s620_s28  ;;  %s1015_s6 = int_to_ptr.vmem [resolvable:$true] %s482_s6 }
  0x20   : > { %v220_v14 = vrot.slane %v211_v9, %v219_v7  ;;  %v229_v15 = vrot.slane %v211_v9, %v228_v8  ;;  %v239_v16 = vrot.slane %v211_v9, %v238_v11  ;;  %v249_v17 = vrot.slane %v211_v9, %v248_v13  ;;  %s497_s7 = sshll.u32 %s201_s15, 4  ;;  %s1012_s9 = scalar_lea.hbm %s1098_s2, %s635_s4  ;;  %s1022_s7 = int_to_ptr.vmem [resolvable:$true] %s497_s7 }
  0x21   : > { %s1020_s20 = scalar_lea.hbm %s1099_s3, %s635_s4  ;;  %s462_s21 = scalar_lea.sflag [#allocation3], %s1001_s24 }
  0x22   : > { %s739_s27 = scalar_lea.vmem %s1015_s6, 128  ;;  %s877_s28 = smov [#allocation2]  }
  0x23   : > { %731 = vset.pattern.permute.xlu0 %v869_v3  ;;  %733 = vset.pattern.permute.xlu1 %v870_v4  ;;  %p740_p0 = scmp.ne.s32.totalorder %s1015_s6, %s739_s27  ;;  %s743_s29 = sshll.u32 %s877_s28, 4  ;;  %s744_s29 = int_to_ptr.vmem [resolvable:$false] %s743_s29 }
  0x24   : > { %223 = vperm.xlu0 %731, %v210_v2   ;;  %243 = vperm.xlu1 %733, %v210_v2   ;;  %s745_s16 = scalar_lea.vmem %s744_s29, 256  ;;  %p746_p4 = scmp.lt.s32.totalorder %s1015_s6, %s744_s29 }
  0x25   : > { %p741_p1 = pnand %p740_p0, %p950_p3  ;;  %p747_p5 = scmp.lt.s32.totalorder %s745_s16, %s739_s27 }
  0x27   : > { %p742_p2 = pneg %p741_p1  ;;  %p748_p6 = por %p747_p5, %p746_p4 }
  0x28   : > { %734 = vset.pattern.permute.xlu0 %v870_v4 }
  0x29   : > { %p749_p7 = pnand %p748_p6, %p742_p2 }
  0x9e   : > { %v215_v10 = vpop.permute.xlu0 %214  ;;  %v234_v12 = vpop.permute.xlu1 %233 }
  0x9f   : > { %v221_v20 = vmul.f32 %v220_v14, %v215_v10  ;;  %v240_v22 = vmul.f32 %v239_v16, %v234_v12 }
  0xa3   : > { %v224_v18 = vpop.permute.xlu0 %223  ;;  %v244_v19 = vpop.permute.xlu1 %243 }
  0xa4   : > { %v230_v21 = vmul.f32 %v229_v15, %v224_v18  ;;  %v250_v24 = vmul.f32 %v249_v17, %v244_v19 }
  0xa6   : > { %v231_v23 = vadd.f32 %v230_v21, %v221_v20 }
  0xa8   : > { %v241_v25 = vadd.f32 %v240_v22, %v231_v23 }
  0xaa   : > { %v980_v26 = vadd.f32 %v250_v24, %v241_v25 }
  0xac   : > { %v255_v27 = vand.u32 2139095040, %v980_v26  ;;  %v252_v31 = vand.u32 2147483647, %v980_v26  ;;  %vm254_vm7 = vcmp.lt.s32.totalorder %v980_v26, 0  ;;  %vm344_vm15 = vweird.f32 %v980_v26 }
  0xae   : > { %v256_v28 = vshrl.u32 %v255_v27, 23  ;;  %v259_v34 = vand.u32 8388607, %v252_v31  ;;  %vm253_vm8 = vcmp.le.f32.partialorder %v252_v31, 0.7853982 }
  0xb0   : > { %v624_v29 = vadd.s32 4294967169, %v256_v28  ;;  %v260_v53 = vor.u32 8388608, %v259_v34 }
  0xb2   : > { %v262_v30 = vadd.s32 1, %v624_v29  ;;  %v300_v3 = vshll.u32 %v260_v53, 8 }
  0xb4   : > { %vm263_vm0 = vcmp.gt.s32.totalorder %v262_v30, 0 }
  0xb5   : > { %v264_v32 = vsel %vm263_vm0, %v262_v30, 0 }
  0xb6   : > { %v266_v33 = vand.u32 31, %v264_v32  ;;  %v265_v36 = vshrl.u32 %v264_v32, 5 }
  0xb8   : > { %v267_v35 = vsub.s32 32, %v266_v33  ;;  %v269_v38 = vshll.u32 %v871_v37, %v266_v33  ;;  %v272_v40 = vshll.u32 %v872_v39, %v266_v33  ;;  %v275_v44 = vshll.u32 %v873_v42, %v266_v33 }
  0xb9   : > { %v278_v47 = vshll.u32 %v874_v45, %v266_v33  ;;  %v281_v50 = vshll.u32 %v875_v48, %v266_v33  ;;  %vm284_vm1 = vcmp.lt.s32.totalorder %v265_v36, 1  ;;  %vm287_vm2 = vcmp.lt.s32.totalorder %v265_v36, 4 }
  0xba   : > { %v270_v41 = vshrl.u32 %v872_v39, %v267_v35  ;;  %v273_v43 = vshrl.u32 %v873_v42, %v267_v35  ;;  %v276_v46 = vshrl.u32 %v874_v45, %v267_v35  ;;  %v279_v49 = vshrl.u32 %v875_v48, %v267_v35 }
  0xbb   : > { %v282_v52 = vshrl.u32 %v876_v51, %v267_v35  ;;  %v268_v62 = vshrl.u32 %v871_v37, %v267_v35  ;;  %vm286_vm3 = vcmp.lt.s32.totalorder %v265_v36, 3  ;;  %vm285_vm4 = vcmp.lt.s32.totalorder %v265_v36, 2 }
  0xbc   : > { %v271_v54 = vor.u32 %v270_v41, %v269_v38  ;;  %v274_v55 = vor.u32 %v273_v43, %v272_v40  ;;  %v277_v56 = vor.u32 %v276_v46, %v275_v44  ;;  %v280_v57 = vor.u32 %v279_v49, %v278_v47 }
  0xbd   : > { %v283_v58 = vor.u32 %v282_v52, %v281_v50 }
  0xbe   : > { %v289_v59 = vsel %vm287_vm2, %v277_v56, 2102212464  ;;  %v292_v60 = vsel %vm284_vm1, %v271_v54, %v274_v55  ;;  %v296_v61 = vsel %vm284_vm1, %v274_v55, %v277_v56  ;;  %v293_v63 = vsel %vm287_vm2, %v280_v57, 920167782 }
  0xbf   : > { %v297_v0 = vsel %vm287_vm2, %v283_v58, 1326507024  ;;  %v294_v1 = vsel %vm286_vm3, %v277_v56, %v293_v63  ;;  %v288_v4 = vsel %vm284_vm1, %v268_v62, %v271_v54  ;;  %v290_v5 = vsel %vm286_vm3, %v274_v55, %v289_v59 }
  0xc0   : > { %v298_v2 = vsel %vm286_vm3, %v280_v57, %v297_v0  ;;  %v295_v6 = vsel %vm285_vm4, %v292_v60, %v294_v1  ;;  %v291_v12 = vsel %vm285_vm4, %v288_v4, %v290_v5 }
  0xc1   : > { %v299_v7 = vsel %vm285_vm4, %v296_v61, %v298_v2  ;;  %v989_v10 = vmul.u32.u64.low %v300_v3, %v295_v6  ;;  %v990_v11 = vmul.u32.u64.high %v300_v3, %v295_v6, %v989_v10  ;;  %v307_v14 = vmul.u32 %v300_v3, %v291_v12 }
  0xc2   : > { %v986_v8 = vmul.u32.u64.low %v300_v3, %v299_v7  ;;  %v987_v9 = vmul.u32.u64.high %v300_v3, %v299_v7, %v986_v8 }
  0xc3   : > { %v310_v13 = vadd.s32 1, %v990_v11 }
  0xc4   : > { %vm309_vm5 = vc.u32 %v987_v9, %v989_v10  ;;  %v308_v27 = vadd.s32 %v989_v10, %v987_v9 }
  0xc5   : > { %v311_v15 = vsel %vm309_vm5, %v310_v13, %v990_v11 }
  0xc6   : > { %v312_v16 = vadd.s32 %v311_v15, %v307_v14 }
  0xc8   : > { %v313_v17 = vadd.s32 536870912, %v312_v16 }
  0xca   : > { %v314_v18 = vshrl.u32 %v313_v17, 30 }
  0xcc   : > { %v315_v19 = vshll.u32 %v314_v18, 30  ;;  %v338_v40 = vsub.s32 4, %v314_v18 }
  0xce   : > { %v316_v20 = vsub.s32 %v312_v16, %v315_v19  ;;  %v339_v43 = vsel %vm254_vm7, %v338_v40, %v314_v18 }
  0xcf   : > { %v341_v45 = vsel %vm253_vm8, 0, %v339_v43 }
  0xd0   : > { %v318_v21 = vsub.s32 0, %v316_v20  ;;  %v449_v46 = vadd.s32 3, %v341_v45  ;;  %v345_v47 = vand.u32 3, %v341_v45 }
  0xd2   : > { %v625_v22 = vmin.u32 %v318_v21, %v316_v20  ;;  %v450_v48 = vand.u32 3, %v449_v46  ;;  %vm350_vm9 = vcmp.eq.s32.totalorder %v345_v47, 2  ;;  %vm347_vm11 = vcmp.eq.s32.totalorder %v345_v47, 0 }
  0xd3   : > { %vm346_vm13 = vcmp.lt.s32.totalorder %v345_v47, 2 }
  0xd4   : > { %v320_v23 = vclz %v625_v22  ;;  %vm455_vm10 = vcmp.eq.s32.totalorder %v450_v48, 2  ;;  %vm452_vm12 = vcmp.eq.s32.totalorder %v450_v48, 0  ;;  %vm451_vm14 = vcmp.lt.s32.totalorder %v450_v48, 2 }
  0xd6   : > { %v626_v24 = vadd.s32 4294967294, %v320_v23 }
  0xd8   : > { %vm627_vm6 = vcmp.lt.s32.totalorder %v626_v24, 0 }
  0xd9   : > { %v323_v25 = vsel %vm627_vm6, 0, %v626_v24 }
  0xda   : > { %v324_v28 = vsub.s32 32, %v323_v25  ;;  %v328_v29 = vsub.s32 4294967266, %v323_v25  ;;  %v325_v30 = vshll.u32 %v316_v20, %v323_v25 }
  0xdc   : > { %v326_v32 = vshrl.u32 %v308_v27, %v324_v28  ;;  %v329_v33 = vadd.s32 127, %v328_v29 }
  0xde   : > { %v327_v34 = vor.u32 %v326_v32, %v325_v30  ;;  %v330_v35 = vshll.u32 %v329_v33, 23 }
  0xe0   : > { %v331_v36 = vor.u32 4788187, %v330_v35  ;;  %v334_v38 = vcvt.s32.f32 %v327_v34 }
  0xe2   : > { %v332_v37 = vand.u32 2147483647, %v331_v36 }
  0xe4   : > { %v335_v39 = vmul.f32 %v334_v38, %v332_v37 }
  0xe6   : > { %v336_v41 = vxor.u32 2147483648, %v335_v39 }
  0xe8   : > { %v337_v42 = vsel %vm254_vm7, %v336_v41, %v335_v39 }
  0xe9   : > { %v340_v44 = vsel %vm253_vm8, %v980_v26, %v337_v42 }
  0xea   : > { %735 = vcosq.f32 %v340_v44 }
  0xeb   : > { %737 = vsinq.f32 %v340_v44 }
  0xf4   : > { %v736_v49 = vpop.eup %735 }
  0xf5   : > { %v738_v50 = vpop.eup %737  ;;  %v351_v31 = vxor.u32 2147483648, %v736_v49 }
  0xf6   : > { %v348_v51 = vxor.u32 2147483648, %v738_v50 }
  0xf7   : > { %v352_v52 = vsel %vm350_vm9, %v351_v31, %v738_v50  ;;  %v457_v53 = vsel %vm455_vm10, %v351_v31, %v738_v50 }
  0xf8   : > { %v349_v54 = vsel %vm347_vm11, %v736_v49, %v348_v51  ;;  %v454_v55 = vsel %vm452_vm12, %v736_v49, %v348_v51 }
  0xf9   : > { %v353_v56 = vsel %vm346_vm13, %v349_v54, %v352_v52  ;;  %v458_v57 = vsel %vm451_vm14, %v454_v55, %v457_v53 }
  0xfa   : > { %v354_v58 = vsel %vm344_vm15, nan, %v353_v56  ;;  %v459_v59 = vsel %vm344_vm15, nan, %v458_v57 }
  0xfb   : > { %355 = vst [vmem:[%s194_s5] sm:$0xff] %v354_v58  ;;  %460 = vst [vmem:[%s201_s15] sm:$0xff] %v459_v59 }
  0xfc   : > { %752 = shalt.err (!%p749_p7)
}
  0xfd   : > { %s753_s4 = scalar_lea.hbm %s1012_s9, 128  ;;  %s757_s8 = scalar_lea.hbm %s1098_s2, 512 }
  0xfe   : > { %p754_p9 = scmp.ne.s32.totalorder %s1012_s9, %s753_s4  ;;  %p758_p12 = scmp.lt.u32.totalorder %s1012_s9, %s1098_s2 }
  0xff   : > { %p759_p13 = scmp.lt.u32.totalorder %s757_s8, %s753_s4  ;;  %p761_p1 = scmp.lt.u32.totalorder %s753_s4, %s1012_s9 }
 0x100   : > { %p755_p10 = pnand %p754_p9, %p950_p3 }
 0x101   : > { %p760_p0 = por %p759_p13, %p758_p12 }
 0x102   : > { %p756_p11 = pneg %p755_p10 }
 0x103   : > { %p762_p2 = por %p761_p1, %p760_p0 }
 0x105   : > { %p763_p4 = pnand %p762_p2, %p756_p11 }
 0x107   : > { %766 = shalt.err (!%p763_p4)
}
 0x108   : > { %644 = dma.vmem_to_hbm [thread:$0]  (%p950_p3), %s1015_s6, 128, %s1012_s9, %s462_s21  }
 0x109   : > { %s467_s27 = scalar_lea.sflag [#allocation5], %s1001_s24  ;;  %s767_s28 = scalar_lea.vmem %s1022_s7, 128 }
 0x10a   : > { %p768_p5 = scmp.ne.s32.totalorder %s1022_s7, %s767_s28  ;;  %s878_s29 = smov [#allocation4]  }
 0x10b   : > { %s771_s16 = sshll.u32 %s878_s29, 4  ;;  %s772_s16 = int_to_ptr.vmem [resolvable:$false] %s771_s16 }
 0x10c   : > { %p769_p6 = pnand %p768_p5, %p950_p3  ;;  %s773_s4 = scalar_lea.vmem %s772_s16, 256 }
 0x10d   : > { %p774_p9 = scmp.lt.s32.totalorder %s1022_s7, %s772_s16  ;;  %p775_p10 = scmp.lt.s32.totalorder %s773_s4, %s767_s28 }
 0x10e   : > { %p770_p7 = pneg %p769_p6 }
 0x10f   : > { %p776_p11 = por %p775_p10, %p774_p9 }
 0x111   : > { %p777_p12 = pnand %p776_p11, %p770_p7 }
 0x113   : > { %780 = shalt.err (!%p777_p12)
}
 0x114   : > { %s781_s24 = scalar_lea.hbm %s1020_s20, 128  ;;  %s785_s21 = scalar_lea.hbm %s1099_s3, 512 }
 0x115   : > { %p782_p13 = scmp.ne.s32.totalorder %s1020_s20, %s781_s24  ;;  %p786_p2 = scmp.lt.u32.totalorder %s1020_s20, %s1099_s3 }
 0x116   : > { %p787_p4 = scmp.lt.u32.totalorder %s785_s21, %s781_s24  ;;  %p789_p6 = scmp.lt.u32.totalorder %s781_s24, %s1020_s20 }
 0x117   : > { %p783_p0 = pnand %p782_p13, %p950_p3 }
 0x118   : > { %p788_p5 = por %p787_p4, %p786_p2 }
 0x119   : > { %p784_p1 = pneg %p783_p0 }
 0x11a   : > { %p790_p7 = por %p789_p6, %p788_p5 }
 0x11c   : > { %p791_p9 = pnand %p790_p7, %p784_p1 }
 0x11e   : > { %794 = shalt.err (!%p791_p9)
}
 0x11f   : > { %645 = dma.vmem_to_hbm [thread:$0]  (%p950_p3), %s1022_s7, 128, %s1020_s20, %s467_s27  }
 0x120 PF: > { %p655_p10 = scmp.ge.s32.totalorder %s865_s19, 2  ;;  %s509_s8 = sand.u32 1, %s837_s12  }
 0x121   : > { %s510_s10 = scalar_lea.sflag [#allocation3], %s509_s8 }
 0x122   : > { %p649_p11 = pnand %p655_p10, %p959_p8 }
 0x124   : > { %828 = dma.done.wait (!%p649_p11), %s510_s10, 128  }
 0x125   : > { %830 = vsyncadd (!%p649_p11), %s510_s10, 4294967168  ;;  %s519_s11 = scalar_lea.sflag [#allocation5], %s509_s8 }
 0x126   : > { %832 = dma.done.wait (!%p649_p11), %s519_s11, 128  }
 0x127   : > { %834 = vsyncadd (!%p649_p11), %s519_s11, 4294967168  ;;  %s20_s19 = sadd.s32 1, %s865_s19   ;;  %s1102_s12 = smov %s841_s13 }
 0x128   : > { %p17_p12 = scmp.ge.s32.totalorder %s20_s19, 6   ;;  %s1103_s13 = smov %s845_s14 }
 0x129   : > { %s1104_s14 = smov %s968_s30  ;;  %s1105_s15 = smov %s857_s17 }
 0x12a   : > { %s1106_s16 = smov %s861_s18  ;;  %s1107_s17 = smov %s1110_s22 }
 0x12b   : > { %s1108_s18 = smov %s1114_s23  ;;  %19 = sbr.rel (!%p17_p12) target bundleno = 7 (0x7), region = 83 }
 0x132   :  { %524 = vsyncpa [#allocation3], 1 }
 0x133   :  { %526 = vsyncpa [#allocation3 + $0x1], 1 }
 0x134   :  { %527 = vsyncpa [#allocation5], 1 }
 0x135   :  { %529 = vsyncpa [#allocation5 + $0x1], 1 }

</bundles_post_ra>
